<compile_context>
chip_gen: v5e
topology: v5e:2x2
jax: 0.10.0
libtpu: 0.0.40
codegen_flags: <defaults>
</compile_context>

<pallas_src>
import functools

import jax
import jax.numpy as jnp
from jax import lax
from jax.experimental import pallas as pl
from jax.experimental.pallas import tpu as pltpu


def _round_up(x, m):
    return (x + m - 1) // m * m


def _vmem_capacity_bytes():
    # Generation-aware sizing: 128 MiB on v5e/v6e, 64 MiB per core on v7x.
    try:
        return int(pltpu.get_tpu_info().vmem_capacity_bytes)
    except Exception:  # query unavailable -> conservative (v7x-sized) default
        return 64 * 1024 * 1024


def _pick_batch_tile(B, T, Cp, slab_w, vmem_cap_bytes):
    """Batch slabs folded per grid step.

    Targets an MXU-friendly R = bt*T in [512, 2048], while (a) keeping >= 2
    parallel grid steps when B >= 2 (megacore sharding) and (b) keeping the
    per-step working set under ~1/8 of physical VMEM (double-buffered blocks
    plus the f32+bf16 slab copies).
    """
    if T % 8 != 0:                  # the (bt*T, Cp) fold must stay sublane-aligned
        return 1
    # rough per-row f32 working set: x + y + out + temporaries (~5*Cp words)
    # plus the f32 slab and its bf16 copy (~6*slab_w bytes)
    bytes_per_row = 5 * 4 * Cp + 6 * slab_w
    cap_rows = max(T, (vmem_cap_bytes // 8) // bytes_per_row)
    cands = [bt for bt in range(1, B + 1)
             if B % bt == 0 and (B < 2 or B // bt >= 2) and bt * T <= cap_rows]
    if not cands:
        return 1
    mxu_friendly = [bt for bt in cands if bt * T <= 2048]
    return max(mxu_friendly) if mxu_friendly else min(cands)


def _block_kernel(x_ref, w_ref, p_ref, out_ref, *, seq_len, c_real,
                  dilation, kernel_size, eps, packed, mxu_dtype):
    bt, T, Cp = x_ref.shape
    R = bt * T
    x = x_ref[...].astype(jnp.float32).reshape(R, Cp)   # fold batch into rows

    # Compile-time masks: row position inside its own (folded) sequence, and
    # the real-channel lane mask (lanes >= c_real are zero padding).
    row_pos = lax.broadcasted_iota(jnp.int32, (R, Cp), 0) % seq_len
    lane_ok = lax.broadcasted_iota(jnp.int32, (R, Cp), 1) < c_real

    p = p_ref[...].astype(jnp.float32)                   # (8, Cp) param stack
    b1, g1, be1 = p[0:1], p[1:2], p[2:3]
    b2, g2, be2 = p[3:4], p[4:5], p[5:6]

    def shift_rows(v, s):
        # v[t] -> v[t-s] with zeros for t-s < 0 (the causal left pad of
        # forward_conv).  pltpu.roll moves data toward higher row indices
        # (jnp.roll semantics); wrapped rows and rows that would leak across a
        # folded-sequence boundary both satisfy row_pos < s and are zeroed.
        if s == 0:
            return v
        if s >= seq_len:
            return jnp.zeros_like(v)
        return jnp.where(row_pos < s, 0.0, pltpu.roll(v, shift=s, axis=0))

    def causal_conv(inp, w_flat, b, dil):
        # y[t, o] = b[o] + sum_k sum_i w[k, i, o] * inp[t - (K-1-k)*dil, i]
        taps = [shift_rows(inp, (kernel_size - 1 - k) * dil)
                for k in range(kernel_size)]
        if packed:
            # K*c_real <= Cp: put tap k's real channels at lanes
            # [k*C, (k+1)*C) via an XLU lane-roll.  Padded lanes are zero, so
            # the rolled taps occupy disjoint lanes and can simply be summed
            # into one Cp-lane contraction group.
            slab = taps[0]
            for k in range(1, kernel_size):
                slab = slab + pltpu.roll(taps[k], shift=k * c_real, axis=1)
        else:
            slab = jnp.concatenate(taps, axis=-1)         # (R, K*Cp)
        y = jnp.dot(slab.astype(mxu_dtype), w_flat,       # bf16 operands,
                    preferred_element_type=jnp.float32)   # f32 accumulation
        return y + b

    def layer_norm(v, gamma, beta):
        # Normalize over the real channels only (padded lanes of v are zero by
        # construction).  Unbiased variance (ddof=1) matches torch.var used by
        # the module's custom LayerNorm; eps matches its 1e-8.
        mean = jnp.sum(v, axis=-1, keepdims=True) * (1.0 / c_real)
        d = jnp.where(lane_ok, v - mean, 0.0)
        var = jnp.sum(d * d, axis=-1, keepdims=True) * (1.0 / (c_real - 1))
        return gamma * (d * lax.rsqrt(var + eps)) + beta

    y = causal_conv(x, w_ref[0], b1, dilation)
    y = jnp.maximum(layer_norm(y, g1, be1), 0.0)
    y = causal_conv(y, w_ref[1], b2, 2 * dilation)
    y = jnp.maximum(layer_norm(y, g2, be2), 0.0)

    out_ref[...] = (x + y).reshape(bt, T, Cp).astype(out_ref.dtype)


def simple_residual_block(x, w1, b1, g1, be1, w2, b2, g2, be2, *,
                          dilation, kernel_size, eps=1e-8,
                          mxu_dtype=jnp.bfloat16, keep_padded_output=False):
    """x: (B, T, C) or (B, T, Cp) already zero-padded.  w*: (K, C_in, C_out)
    == torch conv weight[o, i, 0, k] transposed.  b*/g*/be*: (C,) or (1, C).
    Returns (B, T, C), or (B, T, Cp) if keep_padded_output (for chaining)."""
    B, T, C_in = x.shape
    K = kernel_size
    C = w1.shape[1]                      # real channel count (in == out)
    Cp = _round_up(C, 128)               # lane-dense channel dimension
    packed = K * C <= Cp                 # single 128-lane contraction group
    Kc_pad = Cp if packed else K * Cp

    def prep_vec(v):
        v = jnp.reshape(v, (1, C)).astype(jnp.float32)
        return jnp.pad(v, ((0, 0), (0, Cp - C)))

    def prep_w(w):
        w = w.astype(jnp.float32)
        if packed:                       # (K*C, C) packed contraction layout
            wf = jnp.pad(w.reshape(K * C, C),
                         ((0, Kc_pad - K * C), (0, Cp - C)))
        else:                            # per-tap Cp-padded layout
            wf = jnp.pad(w, ((0, 0), (0, Cp - C), (0, Cp - C))).reshape(K * Cp, Cp)
        return wf.astype(mxu_dtype)

    if C_in == Cp:
        xp = x                           # caller kept the padded layout
    else:
        xp = jnp.pad(x, ((0, 0), (0, 0), (0, Cp - C)))

    w_all = jnp.stack([prep_w(w1), prep_w(w2)])                  # (2, Kc, Cp)
    params = jnp.concatenate(
        [prep_vec(v) for v in (b1, g1, be1, b2, g2, be2)]
        + [jnp.zeros((2, Cp), jnp.float32)], axis=0)             # (8, Cp)

    vmem_cap = _vmem_capacity_bytes()
    vmem_limit = min(vmem_cap * 3 // 4, 112 * 1024 * 1024)
    bt = _pick_batch_tile(B, T, Cp, Kc_pad, vmem_cap)
    grid = (B // bt,)

    kern = functools.partial(
        _block_kernel, seq_len=T, c_real=C, dilation=dilation,
        kernel_size=K, eps=eps, packed=packed, mxu_dtype=mxu_dtype)

    operand_bytes = jnp.dtype(mxu_dtype).itemsize
    flops = 4 * B * T * Kc_pad * Cp                      # 2 convs, 2 flops/MAC
    bytes_accessed = (4 * 2 * B * T * Cp                 # x in + out
                      + 2 * Kc_pad * Cp * operand_bytes  # weights
                      + 4 * 8 * Cp)                      # params
    cost = pl.CostEstimate(flops=flops, transcendentals=2 * B * T,
                           bytes_accessed=bytes_accessed)

    out = pl.pallas_call(
        kern,
        out_shape=jax.ShapeDtypeStruct((B, T, Cp), x.dtype),
        grid=grid,
        in_specs=[
            pl.BlockSpec((bt, T, Cp), lambda i: (i, 0, 0)),      # x slabs
            pl.BlockSpec((2, Kc_pad, Cp), lambda i: (0, 0, 0)),  # both weights
            pl.BlockSpec((8, Cp), lambda i: (0, 0)),             # param stack
        ],
        out_specs=pl.BlockSpec((bt, T, Cp), lambda i: (i, 0, 0)),
        compiler_params=pltpu.CompilerParams(
            dimension_semantics=("parallel",),
            vmem_limit_bytes=vmem_limit),
        cost_estimate=cost,
    )(xp, w_all, params)

    if keep_padded_output or Cp == C:
        return out
    return out[:, :, :C]


def _reference(x, w1, b1, g1, be1, w2, b2, g2, be2, dilation, kernel_size, eps=1e-8):
    # Plain-JAX reference with the module's exact math (unpadded channels, f32).
    K = kernel_size

    def conv(xb, w, b, dil):
        T, C = xb.shape
        acc = jnp.zeros((T, w.shape[-1]), jnp.float32)
        for k in range(K):
            s = (K - 1 - k) * dil
            if s == 0:
                xs = xb
            elif s >= T:
                xs = jnp.zeros_like(xb)
            else:
                xs = jnp.concatenate(
                    [jnp.zeros((s, C), xb.dtype), xb[: T - s]], axis=0)
            acc = acc + xs @ w[k]
        return acc + jnp.reshape(b, (1, -1))

    def ln(v, g, be):
        C = v.shape[-1]
        mean = jnp.mean(v, axis=-1, keepdims=True)
        d = v - mean
        var = jnp.sum(d * d, axis=-1, keepdims=True) / (C - 1)
        return (jnp.reshape(g, (1, -1)) * (d / jnp.sqrt(var + eps))
                + jnp.reshape(be, (1, -1)))

    def one(xb):
        y = conv(xb, w1, b1, dilation)
        y = jnp.maximum(ln(y, g1, be1), 0.0)
        y = conv(y, w2, b2, 2 * dilation)
        y = jnp.maximum(ln(y, g2, be2), 0.0)
        return xb + y

    return jax.vmap(one)(x)


if __name__ == "__main__":
    B, T, C = 2, 16, 8          # batch, sequence length, channels (in == out)
    K, dilation = 3, 1          # kernel_size, base dilation

    key = jax.random.PRNGKey(0)
    kx, kw1, kb1, kw2, kb2 = jax.random.split(key, 5)

    x = jax.random.normal(kx, (B, T, C), jnp.float32)
    # Conv weights as (K, C_in, C_out) == torch weight (C_out, C_in, 1, K)
    # transposed for the in-kernel im2col matmuls.
    w1 = jax.random.normal(kw1, (K, C, C), jnp.float32) * 0.1
    b1 = jax.random.normal(kb1, (1, C), jnp.float32) * 0.1
    w2 = jax.random.normal(kw2, (K, C, C), jnp.float32) * 0.1
    b2 = jax.random.normal(kb2, (1, C), jnp.float32) * 0.1
    # LayerNorm params: gamma=1, beta=0 (module __init__), eps=1e-8.
    g1, be1 = jnp.ones((1, C), jnp.float32), jnp.zeros((1, C), jnp.float32)
    g2, be2 = jnp.ones((1, C), jnp.float32), jnp.zeros((1, C), jnp.float32)

    ref = _reference(x, w1, b1, g1, be1, w2, b2, g2, be2, dilation, K)

    # 1) Exact-math check: f32 MXU operands must match the reference tightly.
    out_f32 = jax.block_until_ready(simple_residual_block(
        x, w1, b1, g1, be1, w2, b2, g2, be2,
        dilation=dilation, kernel_size=K, mxu_dtype=jnp.float32))
    assert out_f32.shape == (B, T, C)
    assert jnp.allclose(out_f32, ref, atol=1e-4, rtol=1e-4), \
        float(jnp.max(jnp.abs(out_f32 - ref)))

    # 2) Default perf config: bf16 MXU operands, f32 accumulation.  Tolerance
    #    reflects bf16 operand rounding through two conv+LayerNorm stages.
    out = jax.block_until_ready(simple_residual_block(
        x, w1, b1, g1, be1, w2, b2, g2, be2, dilation=dilation, kernel_size=K))
    assert out.shape == (B, T, C)
    assert jnp.allclose(out, ref, atol=3e-2, rtol=3e-2), \
        float(jnp.max(jnp.abs(out - ref)))

    print("KERNEL_OK")
</pallas_src>

<mosaic_0001>
module attributes {stable_mosaic.version = 11 : i64} {
  func.func @_block_kernel(%arg0: i32, %arg1: memref<1x16x128xf32, #tpu.memory_space<vmem>>, %arg2: memref<2x128x128xf32, #tpu.memory_space<vmem>>, %arg3: memref<8x128xf32, #tpu.memory_space<vmem>>, %arg4: memref<1x16x128xf32, #tpu.memory_space<vmem>>) attributes {dimension_semantics = [#tpu.dimension_semantics<parallel>], iteration_bounds = array<i64: 2>, scalar_prefetch = 0 : i64, scratch_operands = 0 : i64, tpu.core_type = #tpu.core_type<tc>, window_params = [{transform_indices = @transform_0, window_bounds = array<i64: 1, 16, 128>}, {pipeline_mode = #tpu.pipeline_mode<synchronous>, transform_indices = @transform_1, window_bounds = array<i64: 2, 128, 128>}, {pipeline_mode = #tpu.pipeline_mode<synchronous>, transform_indices = @transform_2, window_bounds = array<i64: 8, 128>}, {transform_indices = @transform_3, window_bounds = array<i64: 1, 16, 128>}]} {
    %c0 = arith.constant 0 : index
    %c0_0 = arith.constant 0 : index
    %c0_1 = arith.constant 0 : index
    %0 = vector.load %arg1[%c0, %c0_0, %c0_1] : memref<1x16x128xf32, #tpu.memory_space<vmem>>, vector<1x16x128xf32>
    %1 = vector.shape_cast %0 : vector<1x16x128xf32> to vector<16x128xf32>
    %2 = tpu.iota {dimensions = array<i32: 0>} : vector<16x128xi32>
    %c16_i32 = arith.constant 16 : i32
    %c0_i32 = arith.constant 0 : i32
    %3 = arith.cmpi eq, %c16_i32, %c0_i32 : i32
    %c1_i32 = arith.constant 1 : i32
    %4 = arith.select %3, %c1_i32, %c16_i32 : i32
    %5 = vector.broadcast %4 : i32 to vector<16x128xi32>
    %6 = arith.remsi %2, %5 : vector<16x128xi32>
    %c0_i32_2 = arith.constant 0 : i32
    %7 = vector.broadcast %c0_i32_2 : i32 to vector<16x128xi32>
    %8 = arith.cmpi ne, %6, %7 : vector<16x128xi32>
    %c0_i32_3 = arith.constant 0 : i32
    %9 = vector.broadcast %c0_i32_3 : i32 to vector<16x128xi32>
    %10 = arith.cmpi slt, %6, %9 : vector<16x128xi32>
    %c0_i32_4 = arith.constant 0 : i32
    %11 = arith.cmpi slt, %4, %c0_i32_4 : i32
    %12 = vector.broadcast %11 : i1 to vector<16x128xi1>
    %13 = vector.broadcast %12 : vector<16x128xi1> to vector<16x128xi1>
    %14 = arith.xori %10, %13 : vector<16x128xi1>
    %15 = arith.andi %14, %8 : vector<16x128xi1>
    %16 = vector.broadcast %4 : i32 to vector<16x128xi32>
    %17 = arith.addi %6, %16 : vector<16x128xi32>
    %18 = arith.select %15, %17, %6 : vector<16x128xi1>, vector<16x128xi32>
    %19 = tpu.iota {dimensions = array<i32: 1>} : vector<16x128xi32>
    %c8_i32 = arith.constant 8 : i32
    %20 = vector.broadcast %c8_i32 : i32 to vector<16x128xi32>
    %21 = arith.cmpi slt, %19, %20 : vector<16x128xi32>
    %c0_5 = arith.constant 0 : index
    %c0_6 = arith.constant 0 : index
    %22 = vector.load %arg3[%c0_5, %c0_6] : memref<8x128xf32, #tpu.memory_space<vmem>>, vector<8x128xf32>
    %23 = vector.extract_strided_slice %22 {offsets = [0, 0], sizes = [1, 128], strides = [1, 1]} : vector<8x128xf32> to vector<1x128xf32>
    %24 = vector.extract_strided_slice %22 {offsets = [1, 0], sizes = [1, 128], strides = [1, 1]} : vector<8x128xf32> to vector<1x128xf32>
    %25 = vector.extract_strided_slice %22 {offsets = [2, 0], sizes = [1, 128], strides = [1, 1]} : vector<8x128xf32> to vector<1x128xf32>
    %26 = vector.extract_strided_slice %22 {offsets = [3, 0], sizes = [1, 128], strides = [1, 1]} : vector<8x128xf32> to vector<1x128xf32>
    %27 = vector.extract_strided_slice %22 {offsets = [4, 0], sizes = [1, 128], strides = [1, 1]} : vector<8x128xf32> to vector<1x128xf32>
    %28 = vector.extract_strided_slice %22 {offsets = [5, 0], sizes = [1, 128], strides = [1, 1]} : vector<8x128xf32> to vector<1x128xf32>
    %c0_7 = arith.constant 0 : index
    %c0_8 = arith.constant 0 : index
    %c0_9 = arith.constant 0 : index
    %29 = vector.load %arg2[%c0_7, %c0_8, %c0_9] : memref<2x128x128xf32, #tpu.memory_space<vmem>>, vector<1x128x128xf32>
    %30 = vector.shape_cast %29 : vector<1x128x128xf32> to vector<128x128xf32>
    %c2_i32 = arith.constant 2 : i32
    %31 = vector.broadcast %c2_i32 : i32 to vector<16x128xi32>
    %32 = arith.cmpi slt, %18, %31 : vector<16x128xi32>
    %c2_i32_10 = arith.constant 2 : i32
    %33 = tpu.dynamic_rotate %1 by %c2_i32_10 dim 0 : vector<16x128xf32>, i32 -> vector<16x128xf32>
    %cst = arith.constant 0.000000e+00 : f32
    %34 = vector.broadcast %cst : f32 to vector<16x128xf32>
    %35 = arith.select %32, %34, %33 : vector<16x128xi1>, vector<16x128xf32>
    %c1_i32_11 = arith.constant 1 : i32
    %36 = vector.broadcast %c1_i32_11 : i32 to vector<16x128xi32>
    %37 = arith.cmpi slt, %18, %36 : vector<16x128xi32>
    %c1_i32_12 = arith.constant 1 : i32
    %38 = tpu.dynamic_rotate %1 by %c1_i32_12 dim 0 : vector<16x128xf32>, i32 -> vector<16x128xf32>
    %cst_13 = arith.constant 0.000000e+00 : f32
    %39 = vector.broadcast %cst_13 : f32 to vector<16x128xf32>
    %40 = arith.select %37, %39, %38 : vector<16x128xi1>, vector<16x128xf32>
    %c8_i32_14 = arith.constant 8 : i32
    %41 = tpu.dynamic_rotate %40 by %c8_i32_14 dim 1 : vector<16x128xf32>, i32 -> vector<16x128xf32>
    %42 = arith.addf %35, %41 : vector<16x128xf32>
    %c16_i32_15 = arith.constant 16 : i32
    %43 = tpu.dynamic_rotate %1 by %c16_i32_15 dim 1 : vector<16x128xf32>, i32 -> vector<16x128xf32>
    %44 = arith.addf %42, %43 : vector<16x128xf32>
    %cst_16 = arith.constant dense<0.000000e+00> : vector<16x128xf32>
    %45 = tpu.matmul %44, %30, %cst_16 {dimension_numbers = #tpu.dot_dimension_numbers<[1], [0], [0], [1], [0, 0, 1, 1], [], []>} : vector<16x128xf32>, vector<128x128xf32>, vector<16x128xf32> -> vector<16x128xf32>
    %46 = vector.broadcast %23 : vector<1x128xf32> to vector<16x128xf32>
    %47 = arith.addf %45, %46 : vector<16x128xf32>
    %cst_17 = arith.constant dense<0.000000e+00> : vector<16xf32>
    %48 = vector.multi_reduction <add>, %47, %cst_17 [1] : vector<16x128xf32> to vector<16xf32>
    %49 = vector.shape_cast %48 : vector<16xf32> to vector<16x1xf32>
    %cst_18 = arith.constant 1.250000e-01 : f32
    %50 = vector.broadcast %cst_18 : f32 to vector<16x1xf32>
    %51 = arith.mulf %49, %50 : vector<16x1xf32>
    %52 = vector.broadcast %51 : vector<16x1xf32> to vector<16x128xf32>
    %53 = arith.subf %47, %52 : vector<16x128xf32>
    %cst_19 = arith.constant 0.000000e+00 : f32
    %54 = vector.broadcast %cst_19 : f32 to vector<16x128xf32>
    %55 = arith.select %21, %53, %54 : vector<16x128xi1>, vector<16x128xf32>
    %56 = arith.mulf %55, %55 : vector<16x128xf32>
    %cst_20 = arith.constant dense<0.000000e+00> : vector<16xf32>
    %57 = vector.multi_reduction <add>, %56, %cst_20 [1] : vector<16x128xf32> to vector<16xf32>
    %58 = vector.shape_cast %57 : vector<16xf32> to vector<16x1xf32>
    %cst_21 = arith.constant 0.142857149 : f32
    %59 = vector.broadcast %cst_21 : f32 to vector<16x1xf32>
    %60 = arith.mulf %58, %59 : vector<16x1xf32>
    %cst_22 = arith.constant 9.99999993E-9 : f32
    %61 = vector.broadcast %cst_22 : f32 to vector<16x1xf32>
    %62 = arith.addf %60, %61 : vector<16x1xf32>
    %63 = math.rsqrt %62 : vector<16x1xf32>
    %64 = vector.broadcast %63 : vector<16x1xf32> to vector<16x128xf32>
    %65 = arith.mulf %55, %64 : vector<16x128xf32>
    %66 = vector.broadcast %24 : vector<1x128xf32> to vector<16x128xf32>
    %67 = arith.mulf %66, %65 : vector<16x128xf32>
    %68 = vector.broadcast %25 : vector<1x128xf32> to vector<16x128xf32>
    %69 = arith.addf %67, %68 : vector<16x128xf32>
    %cst_23 = arith.constant 0.000000e+00 : f32
    %70 = vector.broadcast %cst_23 : f32 to vector<16x128xf32>
    %71 = arith.maximumf %69, %70 : vector<16x128xf32>
    %c1 = arith.constant 1 : index
    %c0_24 = arith.constant 0 : index
    %c0_25 = arith.constant 0 : index
    %72 = vector.load %arg2[%c1, %c0_24, %c0_25] : memref<2x128x128xf32, #tpu.memory_space<vmem>>, vector<1x128x128xf32>
    %73 = vector.shape_cast %72 : vector<1x128x128xf32> to vector<128x128xf32>
    %c4_i32 = arith.constant 4 : i32
    %74 = vector.broadcast %c4_i32 : i32 to vector<16x128xi32>
    %75 = arith.cmpi slt, %18, %74 : vector<16x128xi32>
    %c4_i32_26 = arith.constant 4 : i32
    %76 = tpu.dynamic_rotate %71 by %c4_i32_26 dim 0 : vector<16x128xf32>, i32 -> vector<16x128xf32>
    %cst_27 = arith.constant 0.000000e+00 : f32
    %77 = vector.broadcast %cst_27 : f32 to vector<16x128xf32>
    %78 = arith.select %75, %77, %76 : vector<16x128xi1>, vector<16x128xf32>
    %c2_i32_28 = arith.constant 2 : i32
    %79 = vector.broadcast %c2_i32_28 : i32 to vector<16x128xi32>
    %80 = arith.cmpi slt, %18, %79 : vector<16x128xi32>
    %c2_i32_29 = arith.constant 2 : i32
    %81 = tpu.dynamic_rotate %71 by %c2_i32_29 dim 0 : vector<16x128xf32>, i32 -> vector<16x128xf32>
    %cst_30 = arith.constant 0.000000e+00 : f32
    %82 = vector.broadcast %cst_30 : f32 to vector<16x128xf32>
    %83 = arith.select %80, %82, %81 : vector<16x128xi1>, vector<16x128xf32>
    %c8_i32_31 = arith.constant 8 : i32
    %84 = tpu.dynamic_rotate %83 by %c8_i32_31 dim 1 : vector<16x128xf32>, i32 -> vector<16x128xf32>
    %85 = arith.addf %78, %84 : vector<16x128xf32>
    %c16_i32_32 = arith.constant 16 : i32
    %86 = tpu.dynamic_rotate %71 by %c16_i32_32 dim 1 : vector<16x128xf32>, i32 -> vector<16x128xf32>
    %87 = arith.addf %85, %86 : vector<16x128xf32>
    %cst_33 = arith.constant dense<0.000000e+00> : vector<16x128xf32>
    %88 = tpu.matmul %87, %73, %cst_33 {dimension_numbers = #tpu.dot_dimension_numbers<[1], [0], [0], [1], [0, 0, 1, 1], [], []>} : vector<16x128xf32>, vector<128x128xf32>, vector<16x128xf32> -> vector<16x128xf32>
    %89 = vector.broadcast %26 : vector<1x128xf32> to vector<16x128xf32>
    %90 = arith.addf %88, %89 : vector<16x128xf32>
    %cst_34 = arith.constant dense<0.000000e+00> : vector<16xf32>
    %91 = vector.multi_reduction <add>, %90, %cst_34 [1] : vector<16x128xf32> to vector<16xf32>
    %92 = vector.shape_cast %91 : vector<16xf32> to vector<16x1xf32>
    %cst_35 = arith.constant 1.250000e-01 : f32
    %93 = vector.broadcast %cst_35 : f32 to vector<16x1xf32>
    %94 = arith.mulf %92, %93 : vector<16x1xf32>
    %95 = vector.broadcast %94 : vector<16x1xf32> to vector<16x128xf32>
    %96 = arith.subf %90, %95 : vector<16x128xf32>
    %cst_36 = arith.constant 0.000000e+00 : f32
    %97 = vector.broadcast %cst_36 : f32 to vector<16x128xf32>
    %98 = arith.select %21, %96, %97 : vector<16x128xi1>, vector<16x128xf32>
    %99 = arith.mulf %98, %98 : vector<16x128xf32>
    %cst_37 = arith.constant dense<0.000000e+00> : vector<16xf32>
    %100 = vector.multi_reduction <add>, %99, %cst_37 [1] : vector<16x128xf32> to vector<16xf32>
    %101 = vector.shape_cast %100 : vector<16xf32> to vector<16x1xf32>
    %cst_38 = arith.constant 0.142857149 : f32
    %102 = vector.broadcast %cst_38 : f32 to vector<16x1xf32>
    %103 = arith.mulf %101, %102 : vector<16x1xf32>
    %cst_39 = arith.constant 9.99999993E-9 : f32
    %104 = vector.broadcast %cst_39 : f32 to vector<16x1xf32>
    %105 = arith.addf %103, %104 : vector<16x1xf32>
    %106 = math.rsqrt %105 : vector<16x1xf32>
    %107 = vector.broadcast %106 : vector<16x1xf32> to vector<16x128xf32>
    %108 = arith.mulf %98, %107 : vector<16x128xf32>
    %109 = vector.broadcast %27 : vector<1x128xf32> to vector<16x128xf32>
    %110 = arith.mulf %109, %108 : vector<16x128xf32>
    %111 = vector.broadcast %28 : vector<1x128xf32> to vector<16x128xf32>
    %112 = arith.addf %110, %111 : vector<16x128xf32>
    %cst_40 = arith.constant 0.000000e+00 : f32
    %113 = vector.broadcast %cst_40 : f32 to vector<16x128xf32>
    %114 = arith.maximumf %112, %113 : vector<16x128xf32>
    %115 = arith.addf %1, %114 : vector<16x128xf32>
    %116 = vector.shape_cast %115 : vector<16x128xf32> to vector<1x16x128xf32>
    %c0_41 = arith.constant 0 : index
    %c0_42 = arith.constant 0 : index
    %c0_43 = arith.constant 0 : index
    %117 = vector.load %arg4[%c0_41, %c0_42, %c0_43] : memref<1x16x128xf32, #tpu.memory_space<vmem>>, vector<1x16x128xf32>
    tpu.vector_store %arg4[%c0_41, %c0_42, %c0_43], %116 {strides = array<i32>} : memref<1x16x128xf32, #tpu.memory_space<vmem>>, vector<1x16x128xf32>,
    return
  }
  func.func @transform_0(%arg0: i32) -> (i32, i32, i32) {
    %c0_i32 = arith.constant 0 : i32
    %c0_i32_0 = arith.constant 0 : i32
    %c0_i32_1 = arith.constant 0 : i32
    return %arg0, %c0_i32, %c0_i32_0 : i32, i32, i32
  }
  func.func @transform_1(%arg0: i32) -> (i32, i32, i32) {
    %c0_i32 = arith.constant 0 : i32
    %c0_i32_0 = arith.constant 0 : i32
    %c0_i32_1 = arith.constant 0 : i32
    %c0_i32_2 = arith.constant 0 : i32
    return %c0_i32, %c0_i32_0, %c0_i32_1 : i32, i32, i32
  }
  func.func @transform_2(%arg0: i32) -> (i32, i32) {
    %c0_i32 = arith.constant 0 : i32
    %c0_i32_0 = arith.constant 0 : i32
    %c0_i32_1 = arith.constant 0 : i32
    return %c0_i32, %c0_i32_0 : i32, i32
  }
  func.func @transform_3(%arg0: i32) -> (i32, i32, i32) {
    %c0_i32 = arith.constant 0 : i32
    %c0_i32_0 = arith.constant 0 : i32
    %c0_i32_1 = arith.constant 0 : i32
    return %arg0, %c0_i32, %c0_i32_0 : i32, i32, i32
  }
}

</mosaic_0001>

<bundles_post_ra>
// kernel: tpu_custom_call.1
= control target key start
LH: loop header
LB: loop body
LE: loop exit
PB: predicated region body
PF: predicated region fallthrough
CT: control target
= control target key end

     0   :  { %8 = vsyncpa [#allocation3], 0  ;;  %s1142_s0 = inlined_call_operand.hbm [shape: f32[2,16,128], index: 0, kind: input, shape index: {}]   ;;  %s1143_s1 = inlined_call_operand.hbm [shape: f32[2,128,128], index: 1, kind: input, shape index: {}]   ;;  %s1144_s2 = inlined_call_operand.hbm [shape: f32[8,128], index: 2, kind: input, shape index: {}]   ;;  %s1145_s3 = inlined_call_operand.hbm [shape: f32[2,16,128], index: 3, kind: output, shape index: {}]  }
   0x1   :  { %10 = vsyncpa [#allocation3 + $0x1], 0 }
   0x2   :  { %11 = vsyncpa [#allocation6], 0 }
   0x3   :  { %12 = vsyncpa [#allocation4], 0 }
   0x4   :  { %14 = vsyncpa [#allocation4 + $0x1], 0  ;;  %s926_s12 = smov 0   ;;  %s928_s13 = smov 0  }
   0x5   :  { %s930_s14 = smov 0   ;;  %s932_s15 = smov 0  }
   0x6 LB: > { %s947_s16 = sadd.s32 4294967295, %s897_s15   ;;  %s605_s17 = sadd.s32 4294967294, %s897_s15   ;;  %s897_s15 = sphi %s932_s15, %s1155_s15   ;;  %s893_s14 = sphi %s930_s14, %s1154_s14   ;;  %s889_s13 = sphi %s928_s13, %s1153_s13   ;;  %s885_s12 = sphi %s926_s12, %s1152_s12  }
   0x7   : > { %p40_p0 = scmp.ne.s32.totalorder %s889_s13, %s885_s12  ;;  %p41_p1 = scmp.eq.s32.totalorder %s947_s16, 0 }
   0x8   : > { %p106_p2 = scmp.eq.s32.totalorder %s947_s16, 1  ;;  %p112_p3 = scmp.eq.s32.totalorder %s605_s17, 1 }
   0x9   : > { %p956_p4 = por %p41_p1, %p40_p0  ;;  %p606_p5 = scmp.ge.s32.totalorder %s897_s15, 1 }
   0xa   : > { %p961_p6 = por %p112_p3, %p40_p0  ;;  %p119_p7 = scmp.lt.s32.totalorder %s897_s15, 3 }
   0xb   : > { %s130_s22 = sshll.u32 %s1143_s1, 4  ;;  %s899_s24 = smov [#allocation5]   ;;  %s131_s22 = int_to_ptr.hbm [resolvable:$true] %s130_s22 }
   0xc   : > { %p969_p8 = pnand %p606_p5, %p119_p7  ;;  %s132_s25 = sshll.u32 %s899_s24, 4  ;;  %s133_s25 = int_to_ptr.vmem [resolvable:$true] %s132_s25 }
   0xd   : > { %s145_s28 = sshll.u32 %s1144_s2, 4  ;;  %s900_s29 = smov 128   ;;  %s146_s28 = int_to_ptr.hbm [resolvable:$true] %s145_s28 }
   0xe   : > { %p669_p9 = pneg %p969_p8  ;;  %s901_s30 = smov 8  }
   0xf   : > { %s902_s4 = smov [#allocation7]   ;;  %s985_s6 = sadd.s32 1, %s897_s15  }
  0x10   : > { %p670_p10 = pnand %p669_p9, %p41_p1  ;;  %s147_s5 = sshll.u32 %s902_s4, 4  ;;  %s148_s5 = int_to_ptr.vmem [resolvable:$true] %s147_s5 }
  0x11   : > { %s27_s7 = sadd.s32 1, %s893_s14  ;;  %s24_s8 = ssub.s32 %s897_s15, %s985_s6 }
  0x12   : > { %672 = dma.hbm_to_vmem [thread:$0]  (!%p670_p10), %s131_s22, 4096, %s133_s25, [#allocation6], %s900_s29, %s900_s29, %s901_s30  }
  0x13   : > { %675 = dma.hbm_to_vmem [thread:$0]  (!%p670_p10), %s146_s28, 128, %s148_s5, [#allocation6]  }
  0x14   : > { %p34_p12 = scmp.ne.s32.totalorder %s893_s14, %s889_s13  ;;  %p25_p13 = scmp.eq.s32.totalorder %s24_s8, 0 }
  0x15   : > { %p35_p0 = scmp.eq.s32.totalorder %s897_s15, 0  ;;  %p686_p5 = scmp.lt.s32.totalorder %s897_s15, 2 }
  0x16   : > { %p995_p3 = por %p106_p2, %p34_p12  ;;  %s158_s11 = sand.u32 1, %s893_s14  }
  0x17   : > { %s1001_s10 = scalar_select %p25_p13, %s893_s14, %s27_s7  }
  0x18   : > { %p36_p7 = por %p35_p0, %p34_p12  ;;  %s610_s17 = sshll.u32 %s158_s11, 4 }
  0x19   : > { %s623_s20 = sshll.u32 %s897_s15, 4  ;;  %s162_s25 = scalar_lea.vmem [#allocation2], %s610_s17 }
  0x1a   : > { %s167_s24 = scalar_lea.hbm %s1142_s0, %s623_s20  ;;  %s170_s26 = sshll.u32 %s162_s25, 4  ;;  %s171_s26 = int_to_ptr.vmem [resolvable:$true] %s170_s26 }
  0x1b   : > { %s168_s27 = sshll.u32 %s167_s24, 4  ;;  %p1008_p2 = pnand %p686_p5, %p36_p7  ;;  %s169_s27 = int_to_ptr.hbm [resolvable:$true] %s168_s27 }
  0x1c   : > { %s159_s4 = scalar_lea.sflag [#allocation3], %s158_s11  ;;  %s797_s5 = sshra.s32 %s169_s27, 4  ;;  %s798_s5 = int_to_ptr.hbm [resolvable:$true] %s797_s5 }
  0x1d   : > { %s799_s7 = scalar_lea.hbm %s798_s5, 16  ;;  %p801_p10 = pneg %p1008_p2 }
  0x1e   : > { %p800_p9 = scmp.ne.s32.totalorder %s798_s5, %s799_s7  ;;  %s804_s20 = scalar_lea.hbm %s1142_s0, 32 }
  0x1f   : > { %p805_p0 = scmp.lt.s32.totalorder %s798_s5, %s1142_s0  ;;  %p806_p5 = scmp.lt.s32.totalorder %s804_s20, %s799_s7 }
  0x20   : > { %p802_p12 = pnand %p801_p10, %p800_p9 }
  0x21   : > { %p807_p7 = por %p806_p5, %p805_p0 }
  0x22   : > { %p803_p13 = pneg %p802_p12 }
  0x24   : > { %p808_p11 = pnand %p807_p7, %p803_p13 }
  0x26   : > { %811 = shalt.err (!%p808_p11)
}
  0x27   : > { %679 = dma.hbm_to_vmem [thread:$0]  (!%p1008_p2), %s169_s27, 256, %s171_s26, %s159_s4, %s900_s29, %s900_s29, %s901_s30  }
  0x28   : > { %182 = sbr.rel (%p969_p8) target bundleno = 1106 (0x452), region = 32  ;;  %s1028_s11 = sand.u32 (!%p969_p8), 1, %s889_s13  }
  0x29   : > { %s614_s24 = sshll.u32 (!%p969_p8), %s1028_s11, 4  ;;  %s185_s25 = scalar_lea.sflag (!%p969_p8), [#allocation3], %s1028_s11 }
  0x2a   : > { %s188_s5 = scalar_lea.vmem (!%p969_p8), [#allocation2], %s614_s24 }
  0x2d   : > { %872 = dma.done.wait (%p956_p4), %s185_s25, 256  }
  0x2e   : > { %874 = vsyncadd (%p956_p4), %s185_s25, 4294967040 }
  0x2f   : > { %876 = dma.done.wait (%p41_p1), [#allocation6], 4224  }
  0x30   : > { %878 = vsyncadd (%p41_p1), [#allocation6], 4294963072  ;;  %v224_v0 = vlaneseq  ;;  %v1048_v3 = vld [vmem:[%s188_s5] sm:$0xff]  ;;  %v1050_v4 = vld [vmem:[%s188_s5 + $0x8] sm:$0xff]  ;;  %s903_s18 = smov 8   ;;  %s904_s23 = smov 16  }
  0x31   : > { %v270_v5 = vld [vmem:[#allocation5 + $0x78] sm:$0xff]  ;;  %v282_v6 = vrot.slane %v1048_v3, 7  ;;  %v283_v7 = vrot.slane %v1050_v4, 7  ;;  %v269_v8 = vld [vmem:[#allocation5 + $0x70] sm:$0xff]  ;;  %v268_v9 = vld [vmem:[#allocation5 + $0x68] sm:$0xff]  ;;  %v274_v26 = vrot.slane %v1050_v4, 6 }
  0x32   : > { %v1043_v1 = vshrl.u32 %v224_v0, 7  ;;  %625 = vmatpush.msra.mxu2 %v270_v5  ;;  %302 = vmatpush.msra.mxu0 %v270_v5  ;;  %v267_v13 = vld [vmem:[#allocation5 + $0x60] sm:$0xff]  ;;  %v266_v14 = vld [vmem:[#allocation5 + $0x58] sm:$0xff]  ;;  %v265_v15 = vld [vmem:[#allocation5 + $0x50] sm:$0xff]  ;;  %v273_v27 = vrot.slane %v1048_v3, 6  ;;  %v1076_v45 = vand.u32 127, %v224_v0 }
  0x33   : > { %v264_v16 = vld [vmem:[#allocation5 + $0x48] sm:$0xff]  ;;  %v263_v17 = vld [vmem:[#allocation5 + $0x40] sm:$0xff]  ;;  %v262_v18 = vld [vmem:[#allocation5 + $0x38] sm:$0xff]  ;;  %s624_s29 = sshll.u32 %s947_s16, 4  ;;  %s221_s30 = scalar_lea.vmem [#allocation8], %s614_s24 }
  0x34   : > { %v1046_v2 = vand.u32 15, %v1043_v1  ;;  %vm284_vm0 = vcmp.lt.s32.totalorder %v1043_v1, 1  ;;  %626 = vmatpush.msra.mxu2 %v269_v8  ;;  %303 = vmatpush.msra.mxu0 %v269_v8  ;;  %v261_v19 = vld [vmem:[#allocation5 + $0x30] sm:$0xff]  ;;  %v260_v20 = vld [vmem:[#allocation5 + $0x28] sm:$0xff]  ;;  %v259_v21 = vld [vmem:[#allocation5 + $0x20] sm:$0xff]  ;;  %vm275_vm2 = vcmp.lt.s32.totalorder %v1043_v1, 2  ;;  %s509_s28 = scalar_lea.hbm %s1145_s3, %s624_s29 }
  0x35   : > { %v285_v10 = vsel %vm284_vm0, %v282_v6, %v283_v7  ;;  %v286_v11 = vsel %vm284_vm0, %v283_v7, %v282_v6  ;;  %v258_v22 = vld [vmem:[#allocation5 + $0x18] sm:$0xff]  ;;  %v257_v23 = vld [vmem:[#allocation5 + $0x10] sm:$0xff]  ;;  %v256_v24 = vld [vmem:[#allocation5 + $0x8] sm:$0xff]  ;;  %v277_v30 = vsel %vm275_vm2, %v274_v26, %v273_v27  ;;  %v276_v31 = vsel %vm275_vm2, %v273_v27, %v274_v26  ;;  %s510_s4 = sshll.u32 %s221_s30, 4  ;;  %s512_s7 = sshll.u32 %s509_s28, 4  ;;  %s511_s4 = int_to_ptr.vmem [resolvable:$true] %s510_s4  ;;  %s513_s7 = int_to_ptr.hbm [resolvable:$true] %s512_s7 }
  0x36   : > { %vm280_vm1 = vcmp.lt.s32.totalorder %v1046_v2, 1  ;;  %291 = vrot.lane.b32.xlu0 %v285_v10, %s903_s18  ;;  %627 = vmatpush.msra.mxu2 %v268_v9  ;;  %v255_v25 = vld [vmem:[#allocation5] sm:$0xff]  ;;  %vm271_vm3 = vcmp.lt.s32.totalorder %v1046_v2, 2  ;;  %vm253_vm4 = vcmp.lt.s32.totalorder %v1076_v45, 8  ;;  %vm396_vm11 = vcmp.lt.s32.totalorder %v1043_v1, 4  ;;  %v377_v1 = vld [vmem:[#allocation5 + $0x88] sm:$0xff] }
  0x37   : > { %v287_v12 = vsel %vm280_vm1, 0.0, %v286_v11  ;;  %304 = vmatpush.msra.mxu0 %v268_v9  ;;  %v278_v32 = vsel %vm271_vm3, 0.0, %v277_v30  ;;  %v1072_v39 = vld [vmem:[#allocation7] sm:$0xff]  ;;  %v387_v30 = vld [vmem:[#allocation5 + $0xd8] sm:$0xff]  ;;  %vm392_vm12 = vcmp.lt.s32.totalorder %v1046_v2, 4  ;;  %s498_s16 = scalar_lea.sflag [#allocation4], %s1028_s11 }
  0x38   : > { %289 = vrot.lane.b32.xlu1 %v287_v12, %s903_s18  ;;  %628 = vmatpush.msra.mxu2 %v267_v13  ;;  %v301_v40 = vperm.slane %v1072_v39, 0  ;;  %s841_s8 = sshra.s32 %s513_s7, 4  ;;  %s847_s22 = scalar_lea.hbm %s1145_s3, 32  ;;  %s842_s8 = int_to_ptr.hbm [resolvable:$true] %s841_s8 }
  0x39   : > { %305 = vmatpush.msra.mxu0 %v267_v13  ;;  %v367_v13 = vperm.slane %v1072_v39, 1  ;;  %s843_s17 = scalar_lea.hbm %s842_s8, 16  ;;  %p848_p11 = scmp.lt.s32.totalorder %s842_s8, %s1145_s3 }
  0x3a   : > { %629 = vmatpush.msra.mxu2 %v266_v14  ;;  %p844_p1 = scmp.ne.s32.totalorder %s842_s8, %s843_s17  ;;  %p849_p2 = scmp.lt.s32.totalorder %s847_s22, %s843_s17 }
  0x3b   : > { %306 = vmatpush.msra.mxu0 %v266_v14 }
  0x3c   : > { %630 = vmatpush.msra.mxu2 %v265_v15  ;;  %p845_p4 = pnand %p844_p1, %p995_p3  ;;  %p850_p9 = por %p849_p2, %p848_p11 }
  0x3d   : > { %307 = vmatpush.msra.mxu0 %v265_v15 }
  0x3e   : > { %297 = vrot.lane.b32.xlu0 %v1050_v4, %s904_s23  ;;  %631 = vmatpush.msra.mxu2 %v264_v16  ;;  %p846_p8 = pneg %p845_p4 }
  0x3f   : > { %308 = vmatpush.msra.mxu0 %v264_v16 }
  0x40   : > { %295 = vrot.lane.b32.xlu1 %v1048_v3, %s904_s23  ;;  %632 = vmatpush.msra.mxu2 %v263_v17  ;;  %p851_p10 = pnand %p850_p9, %p846_p8 }
  0x41   : > { %309 = vmatpush.msra.mxu0 %v263_v17  ;;  %v370_v17 = vperm.slane %v1072_v39, 2 }
  0x42   : > { %633 = vmatpush.msra.mxu2 %v262_v18 }
  0x43   : > { %310 = vmatpush.msra.mxu0 %v262_v18 }
  0x44   : > { %634 = vmatpush.msra.mxu2 %v261_v19 }
  0x45   : > { %311 = vmatpush.msra.mxu0 %v261_v19 }
  0x46   : > { %635 = vmatpush.msra.mxu2 %v260_v20 }
  0x47   : > { %312 = vmatpush.msra.mxu0 %v260_v20 }
  0x48   : > { %636 = vmatpush.msra.mxu2 %v259_v21 }
  0x49   : > { %313 = vmatpush.msra.mxu0 %v259_v21 }
  0x4a   : > { %637 = vmatpush.msra.mxu2 %v258_v22 }
  0x4b   : > { %314 = vmatpush.msra.mxu0 %v258_v22  ;;  %v391_v22 = vld [vmem:[#allocation5 + $0xf8] sm:$0xff] }
  0x4c   : > { %638 = vmatpush.msra.mxu2 %v257_v23  ;;  %641 = vmatpush.msra.mxu3 %v391_v22 }
  0x4d   : > { %315 = vmatpush.msra.mxu0 %v257_v23  ;;  %v390_v23 = vld [vmem:[#allocation5 + $0xf0] sm:$0xff]  ;;  %420 = vmatpush.msra.mxu1 %v391_v22 }
  0x4e   : > { %639 = vmatpush.msra.mxu2 %v256_v24  ;;  %642 = vmatpush.msra.mxu3 %v390_v23 }
  0x4f   : > { %316 = vmatpush.msra.mxu0 %v256_v24  ;;  %421 = vmatpush.msra.mxu1 %v390_v23 }
  0x50   : > { %640 = vmatpush.msra.mxu2 %v255_v25 }
  0x51   : > { %317 = vmatpush.msra.mxu0 %v255_v25  ;;  %v389_v25 = vld [vmem:[#allocation5 + $0xe8] sm:$0xff] }
  0x52   : > { %643 = vmatpush.msra.mxu3 %v389_v25  ;;  %422 = vmatpush.msra.mxu1 %v389_v25 }
  0xa8   : > { %v292_v28 = vpop.permute.xlu0 %291 }
  0xa9   : > { %v294_v33 = vadd.f32 %v292_v28, %v276_v31  ;;  %v388_v28 = vld [vmem:[#allocation5 + $0xe0] sm:$0xff]  ;;  %v386_v31 = vld [vmem:[#allocation5 + $0xd0] sm:$0xff] }
  0xaa   : > { %v290_v29 = vpop.permute.xlu1 %289  ;;  %644 = vmatpush.msra.mxu3 %v388_v28  ;;  %423 = vmatpush.msra.mxu1 %v388_v28  ;;  %v485_v28 = vperm.slane %v1072_v39, 4 }
  0xab   : > { %v293_v34 = vadd.f32 %v290_v29, %v278_v32 }
  0xac   : > { %645 = vmatpush.msra.mxu3 %v387_v30  ;;  %424 = vmatpush.msra.mxu1 %v387_v30 }
  0xae   : > { %646 = vmatpush.msra.mxu3 %v386_v31  ;;  %425 = vmatpush.msra.mxu1 %v386_v31  ;;  %v488_v31 = vperm.slane %v1072_v39, 5 }
  0xb0   : > { %v298_v35 = vpop.permute.xlu0 %297 }
  0xb1   : > { %v300_v36 = vadd.f32 %v298_v35, %v294_v33 }
  0xb2   : > { %v296_v37 = vpop.permute.xlu1 %295 }
  0xb3   : > { %v299_v38 = vadd.f32 %v296_v37, %v293_v34  ;;  %321 = vmatmul.f32.vlgmr.msra.gmra.mxu2 %v300_v36  ;;  %v385_v34 = vld [vmem:[#allocation5 + $0xc8] sm:$0xff] }
  0xb4   : > { %647 = vmatpush.msra.mxu3 %v385_v34  ;;  %426 = vmatpush.msra.mxu1 %v385_v34 }
  0xb5   : > { %318 = vmatmul.f32.vlgmr.msra.gmra.mxu0 %v299_v38  ;;  %v384_v38 = vld [vmem:[#allocation5 + $0xc0] sm:$0xff] }
  0xb6   : > { %648 = vmatpush.msra.mxu3 %v384_v38  ;;  %427 = vmatpush.msra.mxu1 %v384_v38 }
 0x132   : > { %v319_v41 = vpop.f32.mrf.mxu0 }
 0x133   : > { %v320_v42 = vadd.f32 %v319_v41, %v301_v40  ;;  %v383_v41 = vld [vmem:[#allocation5 + $0xb8] sm:$0xff] }
 0x134   : > { %649 = vmatpush.msra.mxu3 %v383_v41  ;;  %428 = vmatpush.msra.mxu1 %v383_v41 }
 0x135   : > { %325 = vadd.xlane.f32.xlu2 %v320_v42 }
 0x136   : > { %v322_v43 = vpop.f32.mrf.mxu2 }
 0x137   : > { %v323_v44 = vadd.f32 %v322_v43, %v301_v40  ;;  %v382_v43 = vld [vmem:[#allocation5 + $0xb0] sm:$0xff] }
 0x138   : > { %650 = vmatpush.msra.mxu3 %v382_v43  ;;  %429 = vmatpush.msra.mxu1 %v382_v43 }
 0x13d   : > { %327 = vadd.xlane.f32.xlu2 %v323_v44 }
 0x1a8   : > { %v326_v46 = vpop.xlane.xlu2 %325 }
 0x1a9   : > { %v329_v47 = vmul.f32 0.125, %v326_v46 }
 0x1ab   : > { %v331_v48 = vsub.f32 %v320_v42, %v329_v47  ;;  %v381_v47 = vld [vmem:[#allocation5 + $0xa8] sm:$0xff] }
 0x1ac   : > { %651 = vmatpush.msra.mxu3 %v381_v47  ;;  %430 = vmatpush.msra.mxu1 %v381_v47 }
 0x1ad   : > { %v333_v49 = vsel %vm253_vm4, %v331_v48, 0.0  ;;  %v380_v48 = vld [vmem:[#allocation5 + $0xa0] sm:$0xff] }
 0x1ae   : > { %v335_v50 = vmul.f32 %v333_v49, %v333_v49  ;;  %652 = vmatpush.msra.mxu3 %v380_v48  ;;  %431 = vmatpush.msra.mxu1 %v380_v48 }
 0x1b0   : > { %337 = vadd.xlane.f32.xlu0 %v335_v50  ;;  %v328_v51 = vpop.xlane.xlu2 %327  ;;  %v378_v50 = vld [vmem:[#allocation5 + $0x90] sm:$0xff] }
 0x1b1   : > { %v330_v52 = vmul.f32 0.125, %v328_v51  ;;  %v376_v51 = vld [vmem:[#allocation5 + $0x80] sm:$0xff] }
 0x1b3   : > { %v332_v53 = vsub.f32 %v323_v44, %v330_v52 }
 0x1b5   : > { %v334_v54 = vsel %vm253_vm4, %v332_v53, 0.0 }
 0x1b6   : > { %v336_v55 = vmul.f32 %v334_v54, %v334_v54 }
 0x1b8   : > { %339 = vadd.xlane.f32.xlu1 %v336_v55 }
 0x223   : > { %v338_v56 = vpop.xlane.xlu0 %337 }
 0x224   : > { %v341_v57 = vmul.f32 0.14285715, %v338_v56 }
 0x226   : > { %v343_v58 = vadd.f32 1e-08, %v341_v57 }
 0x228   : > { %729 = vrsqrt.f32 %v343_v58  ;;  %vm351_vm6 = vweird.f32 %v343_v58 }
 0x22b   : > { %v340_v59 = vpop.xlane.xlu1 %339 }
 0x22c   : > { %v342_v60 = vmul.f32 0.14285715, %v340_v59 }
 0x22e   : > { %v730_v61 = vpop.eup %729  ;;  %v344_v62 = vadd.f32 1e-08, %v342_v60 }
 0x22f   : > { %v346_v63 = vmul.f32 %v730_v61, %v343_v58  ;;  %vm352_vm5 = vweird.f32 %v730_v61 }
 0x230   : > { %731 = vrsqrt.f32 %v344_v62  ;;  %vm353_vm7 = vmor %vm351_vm6, %vm352_vm5  ;;  %vm361_vm9 = vweird.f32 %v344_v62 }
 0x231   : > { %v347_v0 = vmul.f32 %v730_v61, %v346_v63 }
 0x233   : > { %v348_v5 = vmul.f32 0.5, %v347_v0 }
 0x235   : > { %v349_v6 = vsub.f32 1.5, %v348_v5 }
 0x236   : > { %v732_v7 = vpop.eup %731 }
 0x237   : > { %v350_v8 = vmul.f32 %v730_v61, %v349_v6  ;;  %v356_v9 = vmul.f32 %v732_v7, %v344_v62  ;;  %vm362_vm8 = vweird.f32 %v732_v7 }
 0x238   : > { %vm363_vm10 = vmor %vm361_vm9, %vm362_vm8 }
 0x239   : > { %v354_v10 = vsel %vm353_vm7, %v730_v61, %v350_v8  ;;  %v357_v11 = vmul.f32 %v732_v7, %v356_v9  ;;  %v419_v61 = vperm.slane %v1072_v39, 3 }
 0x23a   : > { %v365_v12 = vmul.f32 %v354_v10, %v333_v49  ;;  %v379_v49 = vld [vmem:[#allocation5 + $0x98] sm:$0xff] }
 0x23b   : > { %v358_v14 = vmul.f32 0.5, %v357_v11  ;;  %653 = vmatpush.msra.mxu3 %v379_v49  ;;  %432 = vmatpush.msra.mxu1 %v379_v49 }
 0x23c   : > { %v368_v16 = vmul.f32 %v367_v13, %v365_v12 }
 0x23d   : > { %v359_v15 = vsub.f32 1.5, %v358_v14  ;;  %654 = vmatpush.msra.mxu3 %v378_v50  ;;  %433 = vmatpush.msra.mxu1 %v378_v50 }
 0x23e   : > { %v371_v21 = vadd.f32 %v370_v17, %v368_v16 }
 0x23f   : > { %v360_v18 = vmul.f32 %v732_v7, %v359_v15  ;;  %655 = vmatpush.msra.mxu3 %v377_v1  ;;  %434 = vmatpush.msra.mxu1 %v377_v1 }
 0x240   : > { %v373_v27 = vmax.f32 %v371_v21, 0.0 }
 0x241   : > { %v364_v19 = vsel %vm363_vm10, %v732_v7, %v360_v18  ;;  %656 = vmatpush.msra.mxu3 %v376_v51  ;;  %435 = vmatpush.msra.mxu1 %v376_v51 }
 0x242   : > { %v366_v20 = vmul.f32 %v364_v19, %v334_v54  ;;  %v394_v32 = vrot.slane %v373_v27, 4  ;;  %v401_v40 = vrot.slane %v373_v27, 6 }
 0x244   : > { %v369_v24 = vmul.f32 %v367_v13, %v366_v20 }
 0x246   : > { %v372_v26 = vadd.f32 %v370_v17, %v369_v24 }
 0x248   : > { %v374_v29 = vmax.f32 %v372_v26, 0.0 }
 0x24a   : > { %415 = vrot.lane.b32.xlu2 %v374_v29, %s904_s23  ;;  %v395_v33 = vrot.slane %v374_v29, 4  ;;  %v402_v37 = vrot.slane %v374_v29, 6 }
 0x24c   : > { %v397_v35 = vsel %vm396_vm11, %v394_v32, %v395_v33  ;;  %v398_v36 = vsel %vm396_vm11, %v395_v33, %v394_v32  ;;  %v403_v42 = vsel %vm275_vm2, %v401_v40, %v402_v37  ;;  %v404_v44 = vsel %vm275_vm2, %v402_v37, %v401_v40 }
 0x24d   : > { %v405_v46 = vsel %vm271_vm3, 0.0, %v404_v44  ;;  %v399_v57 = vsel %vm392_vm12, 0.0, %v398_v36 }
 0x252   : > { %409 = vrot.lane.b32.xlu2 %v403_v42, %s903_s18 }
 0x25a   : > { %407 = vrot.lane.b32.xlu2 %v405_v46, %s903_s18 }
 0x262   : > { %413 = vrot.lane.b32.xlu2 %v373_v27, %s904_s23 }
 0x2a4   : > { %v416_v52 = vpop.permute.xlu2 %415 }
 0x2ac   : > { %v410_v53 = vpop.permute.xlu2 %409 }
 0x2ad   : > { %v412_v54 = vadd.f32 %v410_v53, %v397_v35 }
 0x2af   : > { %v418_v55 = vadd.f32 %v416_v52, %v412_v54 }
 0x2b1   : > { %439 = vmatmul.f32.vlgmr.msra.gmra.mxu3 %v418_v55 }
 0x2b4   : > { %v408_v56 = vpop.permute.xlu2 %407 }
 0x2b5   : > { %v411_v58 = vadd.f32 %v408_v56, %v399_v57 }
 0x2bc   : > { %v414_v59 = vpop.permute.xlu2 %413 }
 0x2bd   : > { %v417_v60 = vadd.f32 %v414_v59, %v411_v58 }
 0x2bf   : > { %436 = vmatmul.f32.vlgmr.msra.gmra.mxu1 %v417_v60 }
 0x334   : > { %v440_v62 = vpop.f32.mrf.mxu3 }
 0x335   : > { %v441_v63 = vadd.f32 %v440_v62, %v419_v61 }
 0x337   : > { %445 = vadd.xlane.f32.xlu1 %v441_v63 }
 0x33c   : > { %v437_v0 = vpop.f32.mrf.mxu1 }
 0x33d   : > { %v438_v5 = vadd.f32 %v437_v0, %v419_v61 }
 0x33f   : > { %443 = vadd.xlane.f32.xlu0 %v438_v5 }
 0x3aa   : > { %v446_v6 = vpop.xlane.xlu1 %445 }
 0x3ab   : > { %v448_v7 = vmul.f32 0.125, %v446_v6 }
 0x3ad   : > { %v450_v8 = vsub.f32 %v441_v63, %v448_v7 }
 0x3af   : > { %v452_v9 = vsel %vm253_vm4, %v450_v8, 0.0 }
 0x3b0   : > { %v454_v2 = vmul.f32 %v452_v9, %v452_v9 }
 0x3b2   : > { %v444_v10 = vpop.xlane.xlu0 %443  ;;  %457 = vadd.xlane.f32.xlu0 %v454_v2 }
 0x3b3   : > { %v447_v11 = vmul.f32 0.125, %v444_v10 }
 0x3b5   : > { %v449_v12 = vsub.f32 %v438_v5, %v447_v11 }
 0x3b7   : > { %v451_v13 = vsel %vm253_vm4, %v449_v12, 0.0 }
 0x3b8   : > { %v453_v14 = vmul.f32 %v451_v13, %v451_v13 }
 0x3ba   : > { %455 = vadd.xlane.f32.xlu2 %v453_v14 }
 0x425   : > { %v458_v15 = vpop.xlane.xlu0 %457 }
 0x426   : > { %v460_v16 = vmul.f32 0.14285715, %v458_v15 }
 0x428   : > { %v462_v17 = vadd.f32 1e-08, %v460_v16 }
 0x42a   : > { %733 = vrsqrt.f32 %v462_v17  ;;  %vm479_vm14 = vweird.f32 %v462_v17 }
 0x42d   : > { %v456_v18 = vpop.xlane.xlu2 %455 }
 0x42e   : > { %v459_v19 = vmul.f32 0.14285715, %v456_v18 }
 0x430   : > { %v734_v20 = vpop.eup %733  ;;  %v461_v21 = vadd.f32 1e-08, %v459_v19 }
 0x431   : > { %v474_v22 = vmul.f32 %v734_v20, %v462_v17  ;;  %vm480_vm13 = vweird.f32 %v734_v20 }
 0x432   : > { %735 = vrsqrt.f32 %v461_v21  ;;  %vm481_vm15 = vmor %vm479_vm14, %vm480_vm13  ;;  %vm469_vm1 = vweird.f32 %v461_v21 }
 0x433   : > { %v475_v23 = vmul.f32 %v734_v20, %v474_v22 }
 0x435   : > { %v476_v24 = vmul.f32 0.5, %v475_v23 }
 0x437   : > { %v477_v25 = vsub.f32 1.5, %v476_v24 }
 0x438   : > { %v736_v26 = vpop.eup %735 }
 0x439   : > { %v478_v27 = vmul.f32 %v734_v20, %v477_v25  ;;  %v464_v45 = vmul.f32 %v736_v26, %v461_v21  ;;  %vm470_vm0 = vweird.f32 %v736_v26 }
 0x43a   : > { %vm471_vm2 = vmor %vm469_vm1, %vm470_vm0 }
 0x43b   : > { %v482_v29 = vsel %vm481_vm15, %v734_v20, %v478_v27  ;;  %v465_v30 = vmul.f32 %v736_v26, %v464_v45 }
 0x43c   : > { %v484_v32 = vmul.f32 %v482_v29, %v452_v9 }
 0x43d   : > { %v466_v33 = vmul.f32 0.5, %v465_v30 }
 0x43e   : > { %v487_v34 = vmul.f32 %v485_v28, %v484_v32 }
 0x43f   : > { %v467_v35 = vsub.f32 1.5, %v466_v33 }
 0x440   : > { %v490_v36 = vadd.f32 %v488_v31, %v487_v34 }
 0x441   : > { %v468_v37 = vmul.f32 %v736_v26, %v467_v35 }
 0x442   : > { %v492_v38 = vmax.f32 %v490_v36, 0.0 }
 0x443   : > { %v472_v40 = vsel %vm471_vm2, %v736_v26, %v468_v37 }
 0x444   : > { %v494_v41 = vadd.f32 %v492_v38, %v1050_v4  ;;  %v483_v42 = vmul.f32 %v472_v40, %v451_v13 }
 0x446   : > { %v486_v43 = vmul.f32 %v485_v28, %v483_v42  ;;  %496 = vst [vmem:[%s221_s30 + $0x8] sm:$0xff] %v494_v41 }
 0x448   : > { %v489_v39 = vadd.f32 %v488_v31, %v486_v43 }
 0x44a   : > { %v491_v44 = vmax.f32 %v489_v39, 0.0 }
 0x44c   : > { %v493_v46 = vadd.f32 %v491_v44, %v1048_v3 }
 0x44e   : > { %495 = vst [vmem:[%s221_s30] sm:$0xff] %v493_v46 }
 0x44f   : > { %854 = shalt.err (!%p851_p10)
}
 0x450   : > { %s905_s11 = smov 128  }
 0x451   : > { %667 = dma.vmem_to_hbm [thread:$0]  (%p995_p3), %s511_s4, 256, %s513_s7, %s498_s16, %s905_s11, %s905_s11, %s903_s18  }
 0x452 PF: > { %s527_s5 = sand.u32 1, %s885_s12   ;;  %p1151_p12 = scmp.ge.s32.totalorder %s897_s15, 2 }
 0x453   : > { %s528_s23 = scalar_lea.sflag [#allocation4], %s527_s5 }
 0x454   : > { %p681_p13 = pnand %p1151_p12, %p961_p6 }
 0x456   : > { %p682_p0 = pneg %p681_p13 }
 0x458   : > { %880 = dma.done.wait (%p682_p0), %s528_s23, 256  }
 0x459   : > { %882 = vsyncadd (%p682_p0), %s528_s23, 4294967040  ;;  %p17_p5 = scmp.ge.s32.totalorder %s985_s6, 4   ;;  %s1152_s12 = smov %s889_s13 }
 0x45a   : > { %s1153_s13 = smov %s893_s14  ;;  %s1154_s14 = smov %s1001_s10 }
 0x45b   : > { %s1155_s15 = smov %s985_s6  ;;  %19 = sbr.rel (!%p17_p5) target bundleno = 6 (0x6), region = 86 }
 0x460   :  { %534 = vsyncpa [#allocation3], 1 }
 0x461   :  { %536 = vsyncpa [#allocation3 + $0x1], 1 }
 0x462   :  { %537 = vsyncpa [#allocation6], 1 }
 0x463   :  { %538 = vsyncpa [#allocation4], 1 }
 0x464   :  { %540 = vsyncpa [#allocation4 + $0x1], 1 }

</bundles_post_ra>
